<compile_context>
chip_gen: v6e
topology: v6e:2x2x1
jax: 0.10.0
libtpu: 0.0.40
codegen_flags: <defaults>
</compile_context>

<pallas_src>
import math

import jax
import jax.numpy as jnp
from jax.experimental import pallas as pl
from jax.experimental.pallas import tpu as pltpu

# Permutation implemented by this kernel (matches Permute(dims=(0, 2, 3, 1))).
DIMS = (0, 2, 3, 1)


def _vmem_budgets():
    """Return (tile_budget_bytes, vmem_limit_bytes), generation-aware."""
    tile_budget = 8 * 1024 * 1024      # conservative: safe on v7x (64 MiB physical VMEM)
    vmem_limit = 32 * 1024 * 1024
    try:
        info = pltpu.get_tpu_info()
        cap = getattr(info, "vmem_capacity_bytes", None)
        if cap is not None and cap >= 96 * 1024 * 1024:   # v5e / v6e: 128 MiB physical
            tile_budget = 20 * 1024 * 1024
            vmem_limit = 64 * 1024 * 1024
    except Exception:
        pass  # unknown generation -> keep conservative (v7x-safe) budgets
    return tile_budget, vmem_limit


def _choose_tiles(C, HW, G, SUB, itemsize, tile_budget, n_images):
    """Pick (TQ, CH, footprint_bytes): grid tile and in-kernel chunk along H*W.

    Constraints:
      * TQ % 128 == 0 (input lane dim) and (TQ//G) % SUB == 0 (output sublane
        dim), or TQ == HW (full-dim block, always legal).
      * CH divides TQ (chunk loop stays in bounds of the VMEM block).
      * double-buffered, padding-aware footprint stays under the budget.
    """
    c_pad = -(-C // SUB) * SUB                     # sublane-padded channel count
    gc_pad = -(-(G * C) // 128) * 128              # lane-padded output row width

    def footprint(tq, ch):
        in_b = c_pad * tq * itemsize               # padded input tile
        out_b = (tq // G) * gc_pad * itemsize      # padded output tile
        temps = 4 * c_pad * ch * itemsize          # relayout temporaries (per chunk)
        return 2 * (in_b + out_b) + temps          # 2x: double-buffered pipeline

    base = math.lcm(128, G * SUB)                  # smallest legal non-full tile
    if base >= HW:
        return HW, HW, footprint(HW, HW)           # one full block per image

    max_k = min(HW // base, 64)                    # cap in-kernel chunk count
    cands = [k * base for k in range(1, max_k + 1)]
    in_budget = [tq for tq in cands if footprint(tq, base) <= tile_budget]
    if not in_budget:
        return base, base, footprint(base, base)   # smallest legal tile

    # Prefer >=512 B contiguous HBM rows for the strided input DMA.
    pref = [tq for tq in in_budget if tq * itemsize >= 512] or in_budget
    # Guarantee >=2 total grid steps when N == 1 so v7x can use both
    # TensorCores and the pipeline has prefetch/writeback to overlap.
    if n_images == 1:
        pref = [tq for tq in pref if -(-HW // tq) >= 2] or pref
    tq = max(pref)                                 # biggest tile within budget
    return tq, base, footprint(tq, base)


def _make_permute_kernel(C, G, CH, n_chunks):
    GC = G * C
    rows = CH // G          # output rows produced per chunk (multiple of SUB)

    def relayout(xs):
        # xs: (C, CH) -> (CH // G, G*C);  out[r, g*C + c] == xs[c, r*G + g]
        if G == 1:
            return jnp.transpose(xs)
        return jnp.transpose(xs.reshape(C, rows, G), (1, 2, 0)).reshape(rows, GC)

    if n_chunks == 1:
        def kernel(x_ref, o_ref):
            o_ref[...] = relayout(x_ref[...])
        return kernel

    def kernel(x_ref, o_ref):
        # Strip-mine the relayout: one output sublane-group per step so only a
        # few vregs are live at a time (no whole-tile spill through VMEM).
        def body(q, carry):
            col0 = pl.multiple_of(q * CH, 128)     # aligned lane slice of input
            row0 = pl.multiple_of(q * rows, 8)     # aligned sublane rows of output
            xs = x_ref[:, pl.ds(col0, CH)]         # (C, CH)
            o_ref[pl.ds(row0, rows), :] = relayout(xs)
            return carry
        jax.lax.fori_loop(0, n_chunks, body, 0, unroll=(n_chunks <= 32))
    return kernel


def permute_nchw_to_nhwc(x: jax.Array) -> jax.Array:
    """Apply permutation (0, 2, 3, 1) to a 4-D array via a Pallas TPU kernel."""
    N, C, H, W = x.shape
    HW = H * W
    itemsize = jnp.dtype(x.dtype).itemsize
    SUB = max(8, 32 // itemsize)                       # dtype-aware sublane multiple
    # Group G consecutive spatial positions per output row so the trailing dim
    # is a 128-lane multiple whenever HW allows it (lane-dense stores).
    G = math.gcd(128 // math.gcd(C, 128), HW)

    tile_budget, vmem_limit = _vmem_budgets()
    TQ, CH, fp = _choose_tiles(C, HW, G, SUB, itemsize, tile_budget, N)
    vmem_limit = max(vmem_limit, fp + (4 << 20))       # never under-provision the limit
    n_chunks = TQ // CH

    # Free reshapes: lane-dense flattened views on both sides.
    x_flat = x.reshape(N, C, HW)

    out_view = pl.pallas_call(
        _make_permute_kernel(C, G, CH, n_chunks),
        out_shape=jax.ShapeDtypeStruct((N, HW // G, G * C), x.dtype),
        grid_spec=pltpu.PrefetchScalarGridSpec(
            num_scalar_prefetch=0,
            grid=(N, pl.cdiv(HW, TQ)),                 # ragged last block allowed
            in_specs=[
                # (C, TQ): sublane dim is the full C; lane dim TQ is a
                # 128-multiple (or the full HW).
                pl.BlockSpec((pl.Squeezed(), C, TQ), lambda n, q: (n, 0, q)),
            ],
            # (TQ//G, G*C): trailing dim is the full (lane-dense) output row.
            out_specs=pl.BlockSpec((pl.Squeezed(), TQ // G, G * C),
                                   lambda n, q: (n, q, 0)),
        ),
        compiler_params=pltpu.CompilerParams(
            # Every grid step writes a disjoint output block -> both parallel
            # (lets v7x shard across its 2 TensorCores).
            dimension_semantics=("parallel", "parallel"),
            vmem_limit_bytes=vmem_limit,
        ),
    )(x_flat)

    # Free reshape back to NHWC.
    return out_view.reshape(N, H, W, C)


if __name__ == "__main__":
    key = jax.random.PRNGKey(0)

    # Primary small NCHW conv-style input.
    x = jax.random.normal(key, (2, 4, 16, 16), dtype=jnp.float32)
    y = jax.block_until_ready(permute_nchw_to_nhwc(x))
    y_ref = jnp.transpose(x, DIMS)
    assert y.shape == y_ref.shape, (y.shape, y_ref.shape)
    assert y.dtype == y_ref.dtype, (y.dtype, y_ref.dtype)
    assert jnp.array_equal(y, y_ref), "Pallas permute mismatch on (2,4,16,16) f32"

    # Extra small shapes exercising: chunked inner loop, ragged boundary
    # blocks along H*W, and a sub-32-bit dtype (dtype-aware sublane tile).
    extra = [
        ((2, 4, 32, 32), jnp.float32),   # multi-chunk strip-mined relayout
        ((1, 4, 20, 24), jnp.float32),   # ragged last block (TQ does not divide H*W)
        ((2, 8, 16, 16), jnp.bfloat16),  # bf16: SUB = 16
    ]
    for i, (shape, dtype) in enumerate(extra):
        k = jax.random.PRNGKey(i + 1)
        xi = jax.random.normal(k, shape, dtype=jnp.float32).astype(dtype)
        yi = jax.block_until_ready(permute_nchw_to_nhwc(xi))
        yi_ref = jnp.transpose(xi, DIMS)
        assert yi.shape == yi_ref.shape and yi.dtype == yi_ref.dtype
        assert jnp.array_equal(yi, yi_ref), f"Pallas permute mismatch on {shape} {dtype}"

    print("KERNEL_OK")
</pallas_src>

<mosaic_0001>
module attributes {stable_mosaic.version = 11 : i64} {
  func.func @kernel(%arg0: i32, %arg1: i32, %arg2: memref<1x4x256xf32, #tpu.memory_space<vmem>>, %arg3: memref<1x8x128xf32, #tpu.memory_space<vmem>>) attributes {dimension_semantics = [#tpu.dimension_semantics<parallel>, #tpu.dimension_semantics<parallel>], iteration_bounds = array<i64: 2, 1>, scalar_prefetch = 0 : i64, scratch_operands = 0 : i64, tpu.core_type = #tpu.core_type<tc>, window_params = [{transform_indices = @transform_0, window_bounds = array<i64: 1, 4, 256>}, {transform_indices = @transform_1, window_bounds = array<i64: 1, 8, 128>}]} {
    %c0 = arith.constant 0 : index
    %c0_0 = arith.constant 0 : index
    %c0_1 = arith.constant 0 : index
    %0 = vector.load %arg2[%c0, %c0_0, %c0_1] : memref<1x4x256xf32, #tpu.memory_space<vmem>>, vector<1x4x256xf32>
    %1 = vector.shape_cast %0 : vector<1x4x256xf32> to vector<4x256xf32>
    %2 = vector.shape_cast %1 : vector<4x256xf32> to vector<4x8x32xf32>
    %3 = tpu.transpose %2, [1, 2, 0] : vector<4x8x32xf32> -> vector<8x32x4xf32>
    %4 = vector.shape_cast %3 : vector<8x32x4xf32> to vector<8x128xf32>
    %c0_2 = arith.constant 0 : index
    %c0_3 = arith.constant 0 : index
    %c0_4 = arith.constant 0 : index
    %5 = vector.load %arg3[%c0_2, %c0_3, %c0_4] : memref<1x8x128xf32, #tpu.memory_space<vmem>>, vector<1x8x128xf32>
    %6 = vector.shape_cast %5 : vector<1x8x128xf32> to vector<8x128xf32>
    %7 = vector.shape_cast %4 : vector<8x128xf32> to vector<1x8x128xf32>
    tpu.vector_store %arg3[%c0_2, %c0_3, %c0_4], %7 {strides = array<i32>} : memref<1x8x128xf32, #tpu.memory_space<vmem>>, vector<1x8x128xf32>,
    return
  }
  func.func @transform_0(%arg0: i32, %arg1: i32) -> (i32, i32, i32) {
    %c0_i32 = arith.constant 0 : i32
    %c0_i32_0 = arith.constant 0 : i32
    return %arg0, %c0_i32, %arg1 : i32, i32, i32
  }
  func.func @transform_1(%arg0: i32, %arg1: i32) -> (i32, i32, i32) {
    %c0_i32 = arith.constant 0 : i32
    %c0_i32_0 = arith.constant 0 : i32
    return %arg0, %arg1, %c0_i32 : i32, i32, i32
  }
}

</mosaic_0001>

<bundles_post_ra>
// kernel: tpu_custom_call.1
= control target key start
LH: loop header
LB: loop body
LE: loop exit
PB: predicated region body
PF: predicated region fallthrough
CT: control target
= control target key end

     0   :  { %6 = vsyncpa [#allocation3], 0  ;;  %s3758_s0 = inlined_call_operand.hbm [shape: f32[2,4,256], index: 0, kind: input, shape index: {}]   ;;  %s3759_s1 = inlined_call_operand.hbm [shape: f32[2,8,128], index: 1, kind: output, shape index: {}]  }
   0x1   :  { %8 = vsyncpa [#allocation3 + $0x1], 0 }
   0x2   :  { %9 = vsyncpa [#allocation4], 0 }
   0x3   :  { %11 = vsyncpa [#allocation4 + $0x1], 0  ;;  %s3352_s6 = smov 0   ;;  %s3354_s7 = smov 0  }
   0x4   :  { %s3356_s8 = smov 0   ;;  %s3358_s9 = smov 0  }
   0x5   :  { %s3360_s10 = smov 0   ;;  %s3362_s11 = smov 0  }
   0x6 LB: > { %s3051_s12 = sadd.s32 4294967295, %s3304_s11   ;;  %s3052_s13 = sadd.s32 4294967294, %s3304_s11   ;;  %s3304_s11 = sphi %s3362_s11, %s17_s11   ;;  %s3300_s10 = sphi %s3360_s10, %s3771_s10   ;;  %s3296_s9 = sphi %s3358_s9, %s3770_s9   ;;  %s3292_s8 = sphi %s3356_s8, %s3769_s8   ;;  %s3288_s7 = sphi %s3354_s7, %s3768_s7   ;;  %s3284_s6 = sphi %s3352_s6, %s3767_s6  }
   0x7   : > { %s29_s14 = sadd.s32 1, %s3300_s10  ;;  %s38_s15 = sadd.s32 1, %s3292_s8 }
   0x8   : > { %p31_p0 = scmp.ge.s32.totalorder %s29_s14, 2  ;;  %p45_p1 = scmp.ne.s32.totalorder %s3292_s8, %s3288_s7 }
   0x9   : > { %p46_p2 = scmp.eq.s32.totalorder %s3304_s11, 0  ;;  %p51_p3 = scmp.ne.s32.totalorder %s3288_s7, %s3284_s6 }
   0xa   : > { %s3773_s14 = smov (%p31_p0, %s29_s14), 0  ;;  %p52_p5 = scmp.eq.s32.totalorder %s3051_s12, 0 }
   0xb   : > { %p3393_p4 = por %p46_p2, %p45_p1  ;;  %s33_s17 = ssub.s32 %s3300_s10, %s3773_s14 }
   0xc   : > { %p77_p6 = scmp.eq.s32.totalorder %s3051_s12, 1  ;;  %p36_p7 = scmp.eq.s32.totalorder %s33_s17, 0 }
   0xd   : > { %p3399_p8 = por %p52_p5, %p51_p3  ;;  %p83_p10 = scmp.eq.s32.totalorder %s3052_s13, 1 }
   0xe   : > { %p3403_p9 = por %p77_p6, %p45_p1  ;;  %p3112_p13 = scmp.lt.s32.totalorder %s3304_s11, 2 }
   0xf   : > { %s3408_s20 = scalar_select %p36_p7, %s3292_s8, %s38_s15  }
  0x10   : > { %p3410_p11 = por %p83_p10, %p51_p3  ;;  %s103_s22 = sand.u32 1, %s3292_s8  }
  0x11   : > { %s3055_s23 = sshll.u32 %s103_s22, 3  ;;  %s3099_s24 = sshll.u32 %s3300_s10, 7 }
  0x12   : > { %s3763_s21 = scalar_select %p3410_p11, 1, 0 }
  0x13   : > { %s115_s27 = scalar_lea.hbm %s3758_s0, %s3099_s24  ;;  %s107_s28 = scalar_lea.vmem [#allocation2], %s3055_s23 }
  0x14   : > { %s117_s29 = sshll.u32 %s107_s28, 4  ;;  %p3423_p0 = pnand %p3112_p13, %p3393_p4  ;;  %s118_s29 = int_to_ptr.vmem [resolvable:$true] %s117_s29 }
  0x15   : > { %p3058_p1 = scmp.ge.s32.totalorder %s3304_s11, 1  ;;  %p122_p2 = scmp.lt.s32.totalorder %s3304_s11, 3 }
  0x16   : > { %s104_s2 = scalar_lea.sflag [#allocation3], %s103_s22  ;;  %p3198_p3 = pneg %p3423_p0 }
  0x17   : > { %s3209_s3 = scalar_lea.vmem %s118_s29, 128  ;;  %s3306_s4 = smov [#allocation2]  }
  0x18   : > { %p3210_p5 = scmp.ne.s32.totalorder %s118_s29, %s3209_s3  ;;  %s3214_s5 = sshll.u32 %s3306_s4, 4  ;;  %s3215_s5 = int_to_ptr.vmem [resolvable:$false] %s3214_s5 }
  0x19   : > { %s3216_s12 = scalar_lea.vmem %s3215_s5, 256  ;;  %p3217_p10 = scmp.lt.s32.totalorder %s118_s29, %s3215_s5 }
  0x1a   : > { %p3212_p6 = pnand %p3210_p5, %p3198_p3  ;;  %p3218_p12 = scmp.lt.s32.totalorder %s3216_s12, %s3209_s3 }
  0x1c   : > { %p3213_p7 = pneg %p3212_p6  ;;  %p3219_p4 = por %p3218_p12, %p3217_p10 }
  0x1e   : > { %p3220_p13 = pnand %p3219_p4, %p3213_p7 }
  0x20   : > { %3223 = shalt.err (!%p3220_p13)
}
  0x21   : > { %3107 = dma.hbm_to_vmem [thread:$0]  (!%p3423_p0), %s115_s27, 128, %s118_s29, %s104_s2  }
  0x22   : > { %p123_p11 = pnand %p3058_p1, %p122_p2 }
  0x23   : > { %s3438_s13 = sand.u32 (!%p123_p11), 1, %s3288_s7  }
  0x24   : > { %126 = sbr.rel (%p123_p11) target bundleno = 675 (0x2a3), region = 24  ;;  %s3059_s15 = sshll.u32 (!%p123_p11), %s3438_s13, 3 }
  0x25   : > { %s129_s16 = scalar_lea.sflag (!%p123_p11), [#allocation3], %s3438_s13  ;;  %s132_s17 = scalar_lea.vmem (!%p123_p11), [#allocation2], %s3059_s15 }
  0x29   : > { %3275 = dma.done.wait (%p3399_p8), %s129_s16, 128  }
  0x2a   : > { %3277 = vsyncadd (%p3399_p8), %s129_s16, 4294967168  ;;  %v152_v0 = vld [vmem:[%s132_s17] sm:$0xff]  ;;  %s3307_s22 = smov 32   ;;  %s3308_s23 = smov 96   ;;  %v3310_v1 = vmov 1983009808   ;;  %v175_v3 = vlaneseq }
  0x2b   : > { %164 = vrot.lane.b32.xlu1 %v152_v0, %s3307_s22  ;;  %156 = vrot.lane.b32.xlu0 %v152_v0, %s3308_s23  ;;  %s3309_s24 = smov 64   ;;  %v173_v2 = vunpack.c.l.s4 %v3310_v1  ;;  %v3311_v10 = vmov 1934713408   ;;  %v154_v14 = vrot.slane %v152_v0, 4  ;;  %s3313_s18 = smov 8   ;;  %vm2891_vm0 = vcmask 31744  }
  0x2c   : > { %v176_v5 = vshrl.u32 %v175_v3, 7  ;;  %v190_v11 = vunpack.c.l.s4 %v3311_v10  ;;  %s3314_s25 = smov 4   ;;  %s3315_s26 = smov 12   ;;  %vm2893_vm1 = vcmask 64512   ;;  %vm2895_vm2 = vcmask 97280  }
  0x2d   : > { %v174_v4 = vunpack.c.0.s8 %v173_v2  ;;  %s3316_s27 = smov 24   ;;  %s3317_s28 = smov 16   ;;  %vm2897_vm3 = vcmask 130048   ;;  %vm2899_vm4 = vcmask 162816   ;;  %vm2901_vm5 = vcmask 195584  }
  0x2e   : > { %v191_v19 = vunpack.c.0.s8 %v190_v11  ;;  %s3318_s29 = smov 20   ;;  %s3319_s30 = smov 28   ;;  %vm2903_vm6 = vcmask 228352   ;;  %vm2905_vm7 = vcmask 261120   ;;  %vm2907_vm8 = vcmask 293888  }
  0x2f   : > { %160 = vrot.lane.b32.xlu0 %v152_v0, %s3309_s24  ;;  %v3451_v12 = vsub.s32 %v174_v4, %v176_v5  ;;  %s3320_s2 = smov 36   ;;  %s3321_s3 = smov 40   ;;  %vm2909_vm9 = vcmask 326656   ;;  %vm2911_vm10 = vcmask 359424   ;;  %vm2913_vm11 = vcmask 392192  }
  0x30   : > { %v3457_v26 = vsub.s32 %v191_v19, %v176_v5  ;;  %s3322_s4 = smov 44   ;;  %s3323_s5 = smov 48   ;;  %vm2915_vm12 = vcmask 424960   ;;  %vm2917_vm13 = vcmask 457728   ;;  %vm2919_vm14 = vcmask 490496  }
  0x31   : > { %s3324_s12 = smov 52   ;;  %s3325_s16 = smov 56   ;;  %vm2921_vm15 = vcmask 523264  }
  0x32   : > { %s3326_s17 = smov 60  }
  0x9d   : > { %v165_v6 = vpop.permute.xlu1 %164  ;;  %v157_v7 = vpop.permute.xlu0 %156 }
  0x9e   : > { %v166_v8 = vrot.slane %v165_v6, 4  ;;  %v158_v9 = vrot.slane %v157_v7, 4  ;;  %v179_v13 = vcombine.low %v157_v7, %v165_v6 }
  0xa0   : > { %v213_v16 = vcombine.low %v158_v9, %v166_v8  ;;  %v186_v20 = vrot.slane %v179_v13, %v3451_v12  ;;  %v3312_v8 = vmov 0.0  }
  0xa1   : > { %v161_v15 = vpop.permute.xlu0 %160 }
  0xa2   : > { %v162_v17 = vrot.slane %v161_v15, 4  ;;  %v171_v18 = vcombine.low %v152_v0, %v161_v15  ;;  %v220_v23 = vrot.slane %v213_v16, %v3451_v12 }
  0xa4   : > { %v178_v21 = vrot.slane %v171_v18, %v3451_v12  ;;  %v205_v22 = vcombine.low %v154_v14, %v162_v17 }
  0xa6   : > { %v212_v24 = vrot.slane %v205_v22, %v3451_v12  ;;  %v187_v25 = vcombine.low %v178_v21, %v186_v20  ;;  %v188_v33 = vcombine.high %v178_v21, %v186_v20 }
  0xa8   : > { %v221_v27 = vcombine.low %v212_v24, %v220_v23  ;;  %v195_v28 = vrot.slane %v187_v25, %v3457_v26  ;;  %v222_v32 = vcombine.high %v212_v24, %v220_v23  ;;  %v202_v35 = vrot.slane %v188_v33, %v3457_v26 }
  0xaa   : > { %v229_v29 = vrot.slane %v221_v27, %v3457_v26  ;;  %v236_v34 = vrot.slane %v222_v32, %v3457_v26 }
  0xac   : > { %v3061_v30 = vcombine.high %v195_v28, %v229_v29  ;;  %v247_v31 = vcombine.low %v195_v28, %v229_v29  ;;  %v249_v36 = vcombine.low %v202_v35, %v236_v34  ;;  %v3062_v37 = vcombine.high %v202_v35, %v236_v34 }
  0xae   : > { %287 = vxpose.xlu0.b32.start.end [1/1] (short) (narrow) %v3061_v30, 32  ;;  %255 = vxpose.xlu1.b32.start.end [1/1] (short) (narrow) %v247_v31, 32 }
  0xbb   : > { %319 = vxpose.xlu0.b32.start.end [1/1] (short) (narrow) %v249_v36, 32  ;;  %351 = vxpose.xlu1.b32.start.end [1/1] (short) (narrow) %v3062_v37, 32 }
 0x12a   : > { %v303_v38 = vpop.trf.xlu0  ;;  %v271_v39 = vpop.trf.xlu1 }
 0x12e   : > { %v304_v40 = vpop.trf.xlu0  ;;  %v272_v41 = vpop.trf.xlu1 }
 0x132   : > { %v3463_v42 = vpop.trf.xlu0  ;;  %v3465_v43 = vpop.trf.xlu1 }
 0x136   : > { %v3467_v44 = vpop.trf.xlu0  ;;  %v3469_v45 = vpop.trf.xlu1 }
 0x13a   : > { %v335_v46 = vpop.trf.xlu0  ;;  %v367_v47 = vpop.trf.xlu1 }
 0x13b   : > { %v383_v48 = vcombine.low %v271_v39, %v335_v46  ;;  %v384_v49 = vcombine.high %v271_v39, %v335_v46  ;;  %v399_v50 = vcombine.low %v303_v38, %v367_v47  ;;  %v400_v51 = vcombine.high %v303_v38, %v367_v47 }
 0x13d   : > { %v391_v52 = vrot.slane %v383_v48, %v3451_v12  ;;  %v398_v53 = vrot.slane %v384_v49, %v3451_v12  ;;  %v407_v54 = vrot.slane %v399_v50, %v3451_v12  ;;  %v414_v55 = vrot.slane %v400_v51, %v3451_v12 }
 0x13e   : > { %v336_v56 = vpop.trf.xlu0  ;;  %v368_v57 = vpop.trf.xlu1 }
 0x13f   : > { %v431_v58 = vcombine.low %v398_v53, %v414_v55  ;;  %v415_v59 = vcombine.low %v391_v52, %v407_v54  ;;  %v451_v60 = vcombine.low %v272_v41, %v336_v56  ;;  %v467_v61 = vcombine.low %v304_v40, %v368_v57 }
 0x140   : > { %v432_v0 = vcombine.high %v398_v53, %v414_v55  ;;  %v416_v1 = vcombine.high %v391_v52, %v407_v54  ;;  %v452_v6 = vcombine.high %v272_v41, %v336_v56  ;;  %v468_v7 = vcombine.high %v304_v40, %v368_v57 }
 0x141   : > { %v439_v62 = vrot.slane %v431_v58, %v3457_v26  ;;  %v423_v63 = vrot.slane %v415_v59, %v3457_v26  ;;  %v459_v2 = vrot.slane %v451_v60, %v3451_v12  ;;  %v475_v3 = vrot.slane %v467_v61, %v3451_v12 }
 0x142   : > { %v446_v4 = vrot.slane %v432_v0, %v3457_v26  ;;  %v430_v5 = vrot.slane %v416_v1, %v3457_v26  ;;  %v466_v13 = vrot.slane %v452_v6, %v3451_v12  ;;  %v482_v14 = vrot.slane %v468_v7, %v3451_v12  ;;  %v337_v15 = vpop.trf.xlu0  ;;  %v369_v19 = vpop.trf.xlu1 }
 0x143   : > { %783 = vxpose.xlu1.b32.start.end [1/1] (short) (narrow) %v439_v62, 8  ;;  %655 = vxpose.xlu0.b32.start.end [1/1] (short) (narrow) %v423_v63, 8  ;;  %v447_v10 = vcombine.high %v423_v63, %v3312_v8  ;;  %v483_v11 = vcombine.low %v459_v2, %v475_v3  ;;  %v449_v16 = vcombine.high %v439_v62, %v3312_v8 }
 0x144   : > { %v448_v9 = vcombine.high %v430_v5, %v3312_v8  ;;  %v484_v18 = vcombine.high %v459_v2, %v475_v3  ;;  %v519_v20 = vcombine.low %v3465_v43, %v337_v15  ;;  %v535_v21 = vcombine.low %v3463_v42, %v369_v19 }
 0x145   : > { %v491_v17 = vrot.slane %v483_v11, %v3457_v26  ;;  %v450_v22 = vcombine.high %v446_v4, %v3312_v8  ;;  %v499_v24 = vcombine.low %v466_v13, %v482_v14  ;;  %v500_v30 = vcombine.high %v466_v13, %v482_v14 }
 0x146   : > { %v498_v23 = vrot.slane %v484_v18, %v3457_v26  ;;  %v527_v25 = vrot.slane %v519_v20, %v3451_v12  ;;  %v543_v27 = vrot.slane %v535_v21, %v3451_v12  ;;  %v520_v31 = vcombine.high %v3465_v43, %v337_v15  ;;  %v338_v38 = vpop.trf.xlu0  ;;  %v370_v43 = vpop.trf.xlu1 }
 0x147   : > { %847 = vxpose.xlu1.b32.start.end [1/1] (short) (narrow) %v446_v4, 8  ;;  %719 = vxpose.xlu0.b32.start.end [1/1] (short) (narrow) %v430_v5, 8  ;;  %v507_v28 = vrot.slane %v499_v24, %v3457_v26  ;;  %v515_v29 = vcombine.high %v491_v17, %v3312_v8  ;;  %v536_v32 = vcombine.high %v3463_v42, %v369_v19 }
 0x148   : > { %v514_v33 = vrot.slane %v500_v30, %v3457_v26  ;;  %v516_v34 = vcombine.high %v498_v23, %v3312_v8  ;;  %v551_v35 = vcombine.low %v527_v25, %v543_v27  ;;  %v534_v36 = vrot.slane %v520_v31, %v3451_v12 }
 0x149   : > { %v550_v37 = vrot.slane %v536_v32, %v3451_v12  ;;  %v517_v39 = vcombine.high %v507_v28, %v3312_v8  ;;  %v552_v41 = vcombine.high %v527_v25, %v543_v27  ;;  %v587_v42 = vcombine.low %v3469_v45, %v338_v38 }
 0x14a   : > { %v559_v40 = vrot.slane %v551_v35, %v3457_v26  ;;  %v603_v46 = vcombine.low %v3467_v44, %v370_v43  ;;  %v518_v47 = vcombine.high %v514_v33, %v3312_v8  ;;  %v588_v55 = vcombine.high %v3469_v45, %v338_v38 }
 0x14b   : > { %751 = vxpose.xlu0.b32.start.end [1/1] (short) (narrow) %v448_v9, 8  ;;  %687 = vxpose.xlu1.b32.start.end [1/1] (short) (narrow) %v447_v10, 8  ;;  %v566_v48 = vrot.slane %v552_v41, %v3457_v26  ;;  %v567_v49 = vcombine.low %v534_v36, %v550_v37  ;;  %v595_v50 = vrot.slane %v587_v42, %v3451_v12 }
 0x14c   : > { %v611_v51 = vrot.slane %v603_v46, %v3451_v12  ;;  %v583_v53 = vcombine.high %v559_v40, %v3312_v8  ;;  %v568_v54 = vcombine.high %v534_v36, %v550_v37  ;;  %v604_v56 = vcombine.high %v3467_v44, %v370_v43 }
 0x14d   : > { %v575_v52 = vrot.slane %v567_v49, %v3457_v26  ;;  %v584_v58 = vcombine.high %v566_v48, %v3312_v8  ;;  %v602_v60 = vrot.slane %v588_v55, %v3451_v12 }
 0x14e   : > { %v582_v57 = vrot.slane %v568_v54, %v3457_v26  ;;  %v619_v59 = vcombine.low %v595_v50, %v611_v51  ;;  %v618_v61 = vrot.slane %v604_v56, %v3451_v12  ;;  %v620_v0 = vcombine.high %v595_v50, %v611_v51 }
 0x14f   : > { %815 = vxpose.xlu0.b32.start.end [1/1] (short) (narrow) %v449_v16, 8  ;;  %911 = vxpose.xlu1.b32.start.end [1/1] (short) (narrow) %v491_v17, 8  ;;  %v585_v62 = vcombine.high %v575_v52, %v3312_v8 }
 0x150   : > { %v627_v63 = vrot.slane %v619_v59, %v3457_v26  ;;  %v586_v44 = vcombine.high %v582_v57, %v3312_v8  ;;  %v634_v45 = vrot.slane %v620_v0, %v3457_v26  ;;  %v635_v1 = vcombine.low %v602_v60, %v618_v61 }
 0x151   : > { %v636_v4 = vcombine.high %v602_v60, %v618_v61 }
 0x152   : > { %v643_v2 = vrot.slane %v635_v1, %v3457_v26  ;;  %v651_v3 = vcombine.high %v627_v63, %v3312_v8  ;;  %v652_v6 = vcombine.high %v634_v45, %v3312_v8 }
 0x153   : > { %879 = vxpose.xlu0.b32.start.end [1/1] (short) (narrow) %v450_v22, 8  ;;  %975 = vxpose.xlu1.b32.start.end [1/1] (short) (narrow) %v498_v23, 8  ;;  %v650_v5 = vrot.slane %v636_v4, %v3457_v26 }
 0x154   : > { %v653_v7 = vcombine.high %v643_v2, %v3312_v8 }
 0x155   : > { %v654_v9 = vcombine.high %v650_v5, %v3312_v8 }
 0x157   : > { %1039 = vxpose.xlu1.b32.start.end [1/1] (short) (narrow) %v507_v28, 8  ;;  %943 = vxpose.xlu0.b32.start.end [1/1] (short) (narrow) %v515_v29, 8 }
 0x15b   : > { %1103 = vxpose.xlu1.b32.start.end [1/1] (short) (narrow) %v514_v33, 8  ;;  %1007 = vxpose.xlu0.b32.start.end [1/1] (short) (narrow) %v516_v34, 8 }
 0x15f   : > { %1071 = vxpose.xlu0.b32.start.end [1/1] (short) (narrow) %v517_v39, 8  ;;  %1167 = vxpose.xlu1.b32.start.end [1/1] (short) (narrow) %v559_v40, 8 }
 0x163   : > { %1135 = vxpose.xlu0.b32.start.end [1/1] (short) (narrow) %v518_v47, 8  ;;  %1231 = vxpose.xlu1.b32.start.end [1/1] (short) (narrow) %v566_v48, 8 }
 0x167   : > { %1295 = vxpose.xlu1.b32.start.end [1/1] (short) (narrow) %v575_v52, 8  ;;  %1199 = vxpose.xlu0.b32.start.end [1/1] (short) (narrow) %v583_v53, 8 }
 0x16b   : > { %1359 = vxpose.xlu1.b32.start.end [1/1] (short) (narrow) %v582_v57, 8  ;;  %1263 = vxpose.xlu0.b32.start.end [1/1] (short) (narrow) %v584_v58, 8 }
 0x16f   : > { %1327 = vxpose.xlu0.b32.start.end [1/1] (short) (narrow) %v585_v62, 8  ;;  %1423 = vxpose.xlu1.b32.start.end [1/1] (short) (narrow) %v627_v63, 8 }
 0x173   : > { %1391 = vxpose.xlu0.b32.start.end [1/1] (short) (narrow) %v586_v44, 8  ;;  %1487 = vxpose.xlu1.b32.start.end [1/1] (short) (narrow) %v634_v45, 8 }
 0x177   : > { %1551 = vxpose.xlu1.b32.start.end [1/1] (short) (narrow) %v643_v2, 8  ;;  %1455 = vxpose.xlu0.b32.start.end [1/1] (short) (narrow) %v651_v3, 8 }
 0x17b   : > { %1615 = vxpose.xlu1.b32.start.end [1/1] (short) (narrow) %v650_v5, 8  ;;  %1519 = vxpose.xlu0.b32.start.end [1/1] (short) (narrow) %v652_v6, 8 }
 0x17f   : > { %1583 = vxpose.xlu0.b32.start.end [1/1] (short) (narrow) %v653_v7, 8 }
 0x183   : > { %1647 = vxpose.xlu0.b32.start.end [1/1] (short) (narrow) %v654_v9, 8 }
 0x1bf   : > { %v671_v10 = vpop.trf.xlu0  ;;  %v799_v11 = vpop.trf.xlu1 }
 0x1c3   : > { %v735_v13 = vpop.trf.xlu0  ;;  %v863_v14 = vpop.trf.xlu1 }
 0x1c4   : > { %v1679_v15 = vcombine.low %v671_v10, %v735_v13  ;;  %v1680_v16 = vcombine.high %v671_v10, %v735_v13  ;;  %v1711_v8 = vcombine.low %v799_v11, %v863_v14  ;;  %v1712_v25 = vcombine.high %v799_v11, %v863_v14 }
 0x1c6   : > { %v1687_v21 = vrot.slane %v1679_v15, %v3451_v12  ;;  %v1694_v22 = vrot.slane %v1680_v16, %v3451_v12  ;;  %v1719_v37 = vrot.slane %v1711_v8, %v3451_v12  ;;  %v1726_v38 = vrot.slane %v1712_v25, %v3451_v12 }
 0x1c7   : > { %v767_v17 = vpop.trf.xlu0  ;;  %v703_v18 = vpop.trf.xlu1 }
 0x1c8   : > { %v1695_v19 = vcombine.low %v703_v18, %v767_v17  ;;  %v1696_v20 = vcombine.high %v703_v18, %v767_v17 }
 0x1ca   : > { %v1703_v23 = vrot.slane %v1695_v19, %v3451_v12  ;;  %v1710_v24 = vrot.slane %v1696_v20, %v3451_v12 }
 0x1cb   : > { %v831_v27 = vpop.trf.xlu0  ;;  %v927_v28 = vpop.trf.xlu1 }
 0x1cc   : > { %v1743_v29 = vcombine.low %v1687_v21, %v1703_v23  ;;  %v1744_v30 = vcombine.high %v1687_v21, %v1703_v23  ;;  %v1759_v31 = vcombine.low %v1694_v22, %v1710_v24  ;;  %v1760_v32 = vcombine.high %v1694_v22, %v1710_v24 }
 0x1ce   : > { %v1751_v33 = vrot.slane %v1743_v29, %v3457_v26  ;;  %v1758_v34 = vrot.slane %v1744_v30, %v3457_v26  ;;  %v1767_v35 = vrot.slane %v1759_v31, %v3457_v26  ;;  %v1774_v36 = vrot.slane %v1760_v32, %v3457_v26 }
 0x1cf   : > { %v895_v39 = vpop.trf.xlu0  ;;  %v991_v40 = vpop.trf.xlu1 }
 0x1d0   : > { %v3063_v41 = vcombine.low %v1751_v33, %v1758_v34  ;;  %v3065_v43 = vcombine.high %v1751_v33, %v1758_v34  ;;  %v3067_v42 = vcombine.low %v1767_v35, %v1774_v36  ;;  %v3069_v46 = vcombine.high %v1767_v35, %v1774_v36 }
 0x1d1   : > { %v1727_v47 = vcombine.low %v831_v27, %v895_v39  ;;  %v1728_v48 = vcombine.high %v831_v27, %v895_v39  ;;  %v1815_v49 = vcombine.low %v927_v28, %v991_v40  ;;  %v1816_v50 = vcombine.high %v927_v28, %v991_v40 }
 0x1d2   : > { %v2231_v51 = vrot.slane %v3063_v41, %v3451_v12  ;;  %v2247_v52 = vrot.slane %v3065_v43, %v3451_v12  ;;  %v2263_v53 = vrot.slane %v3067_v42, %v3451_v12  ;;  %v2279_v54 = vrot.slane %v3069_v46, %v3451_v12 }
 0x1d3   : > { %v1735_v55 = vrot.slane %v1727_v47, %v3451_v12  ;;  %v1742_v56 = vrot.slane %v1728_v48, %v3451_v12  ;;  %v959_v57 = vpop.trf.xlu0  ;;  %v1823_v58 = vrot.slane %v1815_v49, %v3451_v12  ;;  %v1830_v59 = vrot.slane %v1816_v50, %v3451_v12  ;;  %v1055_v60 = vpop.trf.xlu1 }
 0x1d4   : > { %v2288_v61 = vcombine.high %v2231_v51, %v2247_v52  ;;  %v2320_v62 = vcombine.high %v2263_v53, %v2279_v54  ;;  %v2287_v63 = vcombine.low %v2231_v51, %v2247_v52  ;;  %v2319_v0 = vcombine.low %v2263_v53, %v2279_v54 }
 0x1d5   : > { %v1775_v44 = vcombine.low %v1719_v37, %v1735_v55  ;;  %v1776_v45 = vcombine.high %v1719_v37, %v1735_v55  ;;  %v1791_v1 = vcombine.low %v1726_v38, %v1742_v56  ;;  %v1792_v2 = vcombine.high %v1726_v38, %v1742_v56 }
 0x1d6   : > { %v2302_v3 = vrot.slane %v2288_v61, %v3457_v26  ;;  %v2334_v4 = vrot.slane %v2320_v62, %v3457_v26  ;;  %v3548_v5 = vrot.slane %v2287_v63, %v3457_v26  ;;  %v3551_v6 = vrot.slane %v2319_v0, %v3457_v26 }
 0x1d7   : > { %v1783_v7 = vrot.slane %v1775_v44, %v3457_v26  ;;  %v1790_v9 = vrot.slane %v1776_v45, %v3457_v26  ;;  %v1799_v10 = vrot.slane %v1791_v1, %v3457_v26  ;;  %v1806_v11 = vrot.slane %v1792_v2, %v3457_v26  ;;  %v1023_v13 = vpop.trf.xlu0  ;;  %v1119_v14 = vpop.trf.xlu1 }
 0x1d8   : > { %v1831_v15 = vcombine.low %v959_v57, %v1023_v13  ;;  %v1832_v16 = vcombine.high %v959_v57, %v1023_v13  ;;  %v2353_v17 = vcombine.low %v2302_v3, %v2334_v4  ;;  %v2352_v18 = vcombine.high %v3548_v5, %v3551_v6 }
 0x1d9   : > { %v3064_v19 = vcombine.low %v1783_v7, %v1790_v9  ;;  %v3066_v20 = vcombine.high %v1783_v7, %v1790_v9  ;;  %v3068_v21 = vcombine.low %v1799_v10, %v1806_v11  ;;  %v3070_v22 = vcombine.high %v1799_v10, %v1806_v11 }
 0x1da   : > { %v1839_v23 = vrot.slane %v1831_v15, %v3451_v12  ;;  %v1846_v24 = vrot.slane %v1832_v16, %v3451_v12  ;;  %2772 = vrot.lane.b32.xlu0 %v2353_v17, %s3313_s18  ;;  %2768 = vrot.lane.b32.xlu1 %v2352_v18, %s3314_s25  ;;  %v2354_v8 = vcombine.high %v2302_v3, %v2334_v4  ;;  %s3329_s18 = smov 76   ;;  %s3330_s25 = smov 80  }
 0x1db   : > { %v1087_v25 = vpop.trf.xlu0  ;;  %v1847_v27 = vcombine.low %v1055_v60, %v1119_v14  ;;  %v1848_v28 = vcombine.high %v1055_v60, %v1119_v14  ;;  %v2238_v29 = vrot.slane %v3064_v19, %v3451_v12  ;;  %v2254_v30 = vrot.slane %v3066_v20, %v3451_v12  ;;  %v1183_v31 = vpop.trf.xlu1 }
 0x1dc   : > { %v1879_v32 = vcombine.low %v1823_v58, %v1839_v23  ;;  %v1880_v33 = vcombine.high %v1823_v58, %v1839_v23  ;;  %v1895_v34 = vcombine.low %v1830_v59, %v1846_v24  ;;  %v1896_v35 = vcombine.high %v1830_v59, %v1846_v24 }
 0x1dd   : > { %v1855_v36 = vrot.slane %v1847_v27, %v3451_v12  ;;  %v1862_v37 = vrot.slane %v1848_v28, %v3451_v12  ;;  %v2270_v38 = vrot.slane %v3068_v21, %v3451_v12  ;;  %v2286_v39 = vrot.slane %v3070_v22, %v3451_v12 }
 0x1de   : > { %v1887_v40 = vrot.slane %v1879_v32, %v3457_v26  ;;  %v1894_v41 = vrot.slane %v1880_v33, %v3457_v26  ;;  %v1903_v43 = vrot.slane %v1895_v34, %v3457_v26  ;;  %v1910_v42 = vrot.slane %v1896_v35, %v3457_v26  ;;  %2776 = vrot.lane.b32.xlu1 %v2354_v8, %s3315_s26  ;;  %s3331_s26 = smov 84  }
 0x1df   : > { %v1151_v46 = vpop.trf.xlu0  ;;  %v2304_v47 = vcombine.high %v2238_v29, %v2254_v30  ;;  %v2336_v48 = vcombine.high %v2270_v38, %v2286_v39  ;;  %v2303_v49 = vcombine.low %v2238_v29, %v2254_v30  ;;  %v2335_v50 = vcombine.low %v2270_v38, %v2286_v39  ;;  %v1247_v51 = vpop.trf.xlu1 }
 0x1e0   : > { %v3071_v52 = vcombine.low %v1887_v40, %v1894_v41  ;;  %v3073_v53 = vcombine.high %v1887_v40, %v1894_v41  ;;  %v3075_v54 = vcombine.low %v1903_v43, %v1910_v42  ;;  %v3077_v55 = vcombine.high %v1903_v43, %v1910_v42 }
 0x1e1   : > { %v1863_v56 = vcombine.low %v1087_v25, %v1151_v46  ;;  %v1864_v57 = vcombine.high %v1087_v25, %v1151_v46  ;;  %v3572_v58 = vrot.slane %v2304_v47, %v3457_v26  ;;  %v3575_v59 = vrot.slane %v2336_v48, %v3457_v26 }
 0x1e2   : > { %v2311_v60 = vrot.slane %v2303_v49, %v3457_v26  ;;  %v2343_v61 = vrot.slane %v2335_v50, %v3457_v26  ;;  %v1951_v62 = vcombine.low %v1183_v31, %v1247_v51  ;;  %v1952_v63 = vcombine.high %v1183_v31, %v1247_v51 }
 0x1e3   : > { %v1871_v0 = vrot.slane %v1863_v56, %v3451_v12  ;;  %v1878_v44 = vrot.slane %v1864_v57, %v3451_v12  ;;  %v2357_v45 = vcombine.low %v3572_v58, %v3575_v59  ;;  %v1215_v1 = vpop.trf.xlu0  ;;  %v2358_v2 = vcombine.high %v3572_v58, %v3575_v59  ;;  %v1311_v3 = vpop.trf.xlu1 }
 0x1e4   : > { %v2355_v4 = vcombine.low %v2311_v60, %v2343_v61  ;;  %v2356_v7 = vcombine.high %v2311_v60, %v2343_v61  ;;  %v1959_v9 = vrot.slane %v1951_v62, %v3451_v12  ;;  %v1966_v10 = vrot.slane %v1952_v63, %v3451_v12 }
 0x1e5   : > { %v1911_v11 = vcombine.low %v1855_v36, %v1871_v0  ;;  %v1912_v13 = vcombine.high %v1855_v36, %v1871_v0  ;;  %v1927_v14 = vcombine.low %v1862_v37, %v1878_v44  ;;  %v1928_v15 = vcombine.high %v1862_v37, %v1878_v44  ;;  %2788 = vrot.lane.b32.xlu0 %v2357_v45, %s3316_s27  ;;  %s3332_s27 = smov 88  }
 0x1e6   : > { %2780 = vrot.lane.b32.xlu1 %v2355_v4, %s3317_s28  ;;  %v2367_v16 = vrot.slane %v3071_v52, %v3451_v12  ;;  %v2383_v17 = vrot.slane %v3073_v53, %v3451_v12  ;;  %v2399_v18 = vrot.slane %v3075_v54, %v3451_v12  ;;  %v2415_v19 = vrot.slane %v3077_v55, %v3451_v12  ;;  %s3333_s28 = smov 92  }
 0x1e7   : > { %v1919_v20 = vrot.slane %v1911_v11, %v3457_v26  ;;  %v1926_v21 = vrot.slane %v1912_v13, %v3457_v26  ;;  %v1935_v22 = vrot.slane %v1927_v14, %v3457_v26  ;;  %v1942_v23 = vrot.slane %v1928_v15, %v3457_v26  ;;  %v1279_v24 = vpop.trf.xlu0  ;;  %v1375_v8 = vpop.trf.xlu1 }
 0x1e8   : > { %v1967_v25 = vcombine.low %v1215_v1, %v1279_v24  ;;  %v1968_v27 = vcombine.high %v1215_v1, %v1279_v24  ;;  %v2423_v28 = vcombine.low %v2367_v16, %v2383_v17  ;;  %v2455_v29 = vcombine.low %v2399_v18, %v2415_v19 }
 0x1e9   : > { %v3072_v30 = vcombine.low %v1919_v20, %v1926_v21  ;;  %v3074_v31 = vcombine.high %v1919_v20, %v1926_v21  ;;  %v3076_v32 = vcombine.low %v1935_v22, %v1942_v23  ;;  %v3078_v33 = vcombine.high %v1935_v22, %v1942_v23 }
 0x1ea   : > { %2784 = vrot.lane.b32.xlu1 %v2356_v7, %s3318_s29  ;;  %v1975_v34 = vrot.slane %v1967_v25, %v3451_v12  ;;  %v1982_v35 = vrot.slane %v1968_v27, %v3451_v12  ;;  %v2431_v36 = vrot.slane %v2423_v28, %v3457_v26  ;;  %v2463_v37 = vrot.slane %v2455_v29, %v3457_v26  ;;  %s3334_s29 = smov 100  }
 0x1eb   : > { %v1343_v38 = vpop.trf.xlu0  ;;  %v2424_v39 = vcombine.high %v2367_v16, %v2383_v17  ;;  %v2456_v40 = vcombine.high %v2399_v18, %v2415_v19  ;;  %v1983_v41 = vcombine.low %v1311_v3, %v1375_v8  ;;  %v1984_v43 = vcombine.high %v1311_v3, %v1375_v8  ;;  %v1439_v42 = vpop.trf.xlu1 }
 0x1ec   : > { %v2015_v46 = vcombine.low %v1959_v9, %v1975_v34  ;;  %v2016_v47 = vcombine.high %v1959_v9, %v1975_v34  ;;  %v2031_v48 = vcombine.low %v1966_v10, %v1982_v35  ;;  %v2032_v49 = vcombine.high %v1966_v10, %v1982_v35 }
 0x1ed   : > { %v2487_v50 = vcombine.low %v2431_v36, %v2463_v37  ;;  %v2488_v51 = vcombine.high %v2431_v36, %v2463_v37  ;;  %v2438_v52 = vrot.slane %v2424_v39, %v3457_v26  ;;  %v2470_v53 = vrot.slane %v2456_v40, %v3457_v26 }
 0x1ee   : > { %v3602_v54 = vrot.slane %v2015_v46, %v3457_v26  ;;  %v3605_v55 = vrot.slane %v2016_v47, %v3457_v26  ;;  %v3608_v56 = vrot.slane %v2031_v48, %v3457_v26  ;;  %v3611_v57 = vrot.slane %v2032_v49, %v3457_v26  ;;  %2792 = vrot.lane.b32.xlu1 %v2358_v2, %s3319_s30  ;;  %s3335_s30 = smov 104  }
 0x1ef   : > { %2796 = vrot.lane.b32.xlu0 %v2487_v50, %s3307_s22  ;;  %v2489_v58 = vcombine.low %v2438_v52, %v2470_v53  ;;  %v1991_v59 = vrot.slane %v1983_v41, %v3451_v12  ;;  %v1998_v60 = vrot.slane %v1984_v43, %v3451_v12  ;;  %v1407_v61 = vpop.trf.xlu0  ;;  %v2490_v62 = vcombine.high %v2438_v52, %v2470_v53  ;;  %v1503_v63 = vpop.trf.xlu1  ;;  %s3327_s22 = smov 68  }
 0x1f0   : > { %v3079_v0 = vcombine.low %v3602_v54, %v3605_v55  ;;  %v3081_v44 = vcombine.high %v3602_v54, %v3605_v55  ;;  %v3083_v45 = vcombine.low %v3608_v56, %v3611_v57  ;;  %v3085_v1 = vcombine.high %v3608_v56, %v3611_v57 }
 0x1f1   : > { %v1999_v2 = vcombine.low %v1343_v38, %v1407_v61  ;;  %v2000_v3 = vcombine.high %v1343_v38, %v1407_v61  ;;  %v2374_v4 = vrot.slane %v3072_v30, %v3451_v12  ;;  %v2390_v7 = vrot.slane %v3074_v31, %v3451_v12 }
 0x1f2   : > { %2800 = vrot.lane.b32.xlu1 %v2488_v51, %s3320_s2  ;;  %v2406_v9 = vrot.slane %v3076_v32, %v3451_v12  ;;  %v2422_v10 = vrot.slane %v3078_v33, %v3451_v12  ;;  %v2087_v11 = vcombine.low %v1439_v42, %v1503_v63  ;;  %v2088_v13 = vcombine.high %v1439_v42, %v1503_v63  ;;  %s3336_s2 = smov 108  }
 0x1f3   : > { %2804 = vrot.lane.b32.xlu0 %v2489_v58, %s3321_s3  ;;  %v2007_v14 = vrot.slane %v1999_v2, %v3451_v12  ;;  %v2014_v15 = vrot.slane %v2000_v3, %v3451_v12  ;;  %v2439_v16 = vcombine.low %v2374_v4, %v2390_v7  ;;  %v1471_v17 = vpop.trf.xlu0  ;;  %v2440_v18 = vcombine.high %v2374_v4, %v2390_v7  ;;  %v3630_v19 = vpop.trf.xlu1  ;;  %s3338_s3 = smov 116  }
 0x1f4   : > { %v2471_v20 = vcombine.low %v2406_v9, %v2422_v10  ;;  %v2472_v21 = vcombine.high %v2406_v9, %v2422_v10  ;;  %v2095_v22 = vrot.slane %v2087_v11, %v3451_v12  ;;  %v2102_v23 = vrot.slane %v2088_v13, %v3451_v12 }
 0x1f5   : > { %v2047_v24 = vcombine.low %v1991_v59, %v2007_v14  ;;  %v2048_v8 = vcombine.high %v1991_v59, %v2007_v14  ;;  %v2063_v25 = vcombine.low %v1998_v60, %v2014_v15  ;;  %v2064_v27 = vcombine.high %v1998_v60, %v2014_v15 }
 0x1f6   : > { %2808 = vrot.lane.b32.xlu1 %v2490_v62, %s3322_s4  ;;  %v2447_v28 = vrot.slane %v2439_v16, %v3457_v26  ;;  %v2479_v29 = vrot.slane %v2471_v20, %v3457_v26  ;;  %v2454_v30 = vrot.slane %v2440_v18, %v3457_v26  ;;  %v2486_v31 = vrot.slane %v2472_v21, %v3457_v26  ;;  %s3339_s4 = smov 120  }
 0x1f7   : > { %v3639_v32 = vrot.slane %v2047_v24, %v3457_v26  ;;  %v3642_v33 = vrot.slane %v2048_v8, %v3457_v26  ;;  %v3645_v34 = vrot.slane %v2063_v25, %v3457_v26  ;;  %v3648_v35 = vrot.slane %v2064_v27, %v3457_v26  ;;  %v1535_v36 = vpop.trf.xlu0  ;;  %v1631_v47 = vpop.trf.xlu1 }
 0x1f8   : > { %v2491_v37 = vcombine.low %v2447_v28, %v2479_v29  ;;  %v2492_v38 = vcombine.high %v2447_v28, %v2479_v29  ;;  %v2493_v39 = vcombine.low %v2454_v30, %v2486_v31  ;;  %v2103_v40 = vcombine.low %v1471_v17, %v1535_v36 }
 0x1f9   : > { %v3080_v41 = vcombine.low %v3639_v32, %v3642_v33  ;;  %v3082_v43 = vcombine.high %v3639_v32, %v3642_v33  ;;  %v3084_v42 = vcombine.low %v3645_v34, %v3648_v35  ;;  %v3086_v46 = vcombine.high %v3645_v34, %v3648_v35 }
 0x1fa   : > { %2812 = vrot.lane.b32.xlu0 %v2491_v37, %s3323_s5  ;;  %2816 = vrot.lane.b32.xlu1 %v2492_v38, %s3324_s12  ;;  %v2104_v48 = vcombine.high %v1471_v17, %v1535_v36  ;;  %v2111_v49 = vrot.slane %v2103_v40, %v3451_v12  ;;  %v2494_v50 = vcombine.high %v2454_v30, %v2486_v31  ;;  %s3340_s5 = smov 124   ;;  %s3096_s12 = sshll.u32 %s3296_s9, 7 }
 0x1fb   : > { %v2503_v51 = vrot.slane %v3079_v0, %v3451_v12  ;;  %v2519_v52 = vrot.slane %v3081_v44, %v3451_v12  ;;  %v2535_v53 = vrot.slane %v3083_v45, %v3451_v12  ;;  %v2551_v54 = vrot.slane %v3085_v1, %v3451_v12  ;;  %v1599_v55 = vpop.trf.xlu0  ;;  %s3341_s9 = smov [#allocation5]  }
 0x1fc   : > { %v2118_v56 = vrot.slane %v2104_v48, %v3451_v12  ;;  %v2151_v57 = vcombine.low %v2095_v22, %v2111_v49  ;;  %v2152_v58 = vcombine.high %v2095_v22, %v2111_v49  ;;  %v2119_v59 = vcombine.low %v3630_v19, %v1631_v47 }
 0x1fd   : > { %v2559_v60 = vcombine.low %v2503_v51, %v2519_v52  ;;  %v2591_v61 = vcombine.low %v2535_v53, %v2551_v54  ;;  %v2560_v62 = vcombine.high %v2503_v51, %v2519_v52  ;;  %v2592_v63 = vcombine.high %v2535_v53, %v2551_v54 }
 0x1fe   : > { %2820 = vrot.lane.b32.xlu0 %v2493_v39, %s3325_s16  ;;  %v2159_v0 = vrot.slane %v2151_v57, %v3457_v26  ;;  %v2166_v44 = vrot.slane %v2152_v58, %v3457_v26  ;;  %v2167_v45 = vcombine.low %v2102_v23, %v2118_v56  ;;  %v2168_v2 = vcombine.high %v2102_v23, %v2118_v56  ;;  %s150_s16 = scalar_lea.vmem [#allocation5], %s3059_s15  ;;  %s3228_s15 = sshll.u32 %s3341_s9, 4  ;;  %s3229_s15 = int_to_ptr.vmem [resolvable:$false] %s3228_s15 }
 0x1ff   : > { %2824 = vrot.lane.b32.xlu1 %v2494_v50, %s3326_s17  ;;  %v2567_v1 = vrot.slane %v2559_v60, %v3457_v26  ;;  %v2599_v3 = vrot.slane %v2591_v61, %v3457_v26  ;;  %v2574_v4 = vrot.slane %v2560_v62, %v3457_v26  ;;  %v2606_v7 = vrot.slane %v2592_v63, %v3457_v26  ;;  %v1663_v9 = vpop.trf.xlu0  ;;  %s2969_s17 = sshll.u32 %s150_s16, 4  ;;  %s2970_s17 = int_to_ptr.vmem [resolvable:$true] %s2969_s17 }
 0x200   : > { %v2175_v10 = vrot.slane %v2167_v45, %v3457_v26  ;;  %v2182_v11 = vrot.slane %v2168_v2, %v3457_v26  ;;  %v3087_v13 = vcombine.low %v2159_v0, %v2166_v44  ;;  %v3089_v14 = vcombine.high %v2159_v0, %v2166_v44  ;;  %p3231_p0 = scmp.lt.s32.totalorder %s2970_s17, %s3229_s15 }
 0x201   : > { %v2623_v15 = vcombine.low %v2567_v1, %v2599_v3  ;;  %v2624_v16 = vcombine.high %v2567_v1, %v2599_v3  ;;  %v2625_v17 = vcombine.low %v2574_v4, %v2606_v7  ;;  %v2120_v18 = vcombine.high %v3630_v19, %v1631_v47 }
 0x202   : > { %v3091_v20 = vcombine.low %v2175_v10, %v2182_v11  ;;  %v3093_v21 = vcombine.high %v2175_v10, %v2182_v11  ;;  %v2127_v22 = vrot.slane %v2119_v59, %v3451_v12  ;;  %v2135_v23 = vcombine.low %v1599_v55, %v1663_v9 }
 0x203   : > { %2828 = vrot.lane.b32.xlu0 %v2623_v15, %s3309_s24  ;;  %2832 = vrot.lane.b32.xlu1 %v2624_v16, %s3327_s22  ;;  %v2134_v24 = vrot.slane %v2120_v18, %v3451_v12  ;;  %v2136_v8 = vcombine.high %v1599_v55, %v1663_v9  ;;  %v2626_v25 = vcombine.high %v2574_v4, %v2606_v7  ;;  %s3328_s24 = smov 72  }
 0x204   : > { %v2143_v27 = vrot.slane %v2135_v23, %v3451_v12  ;;  %v2510_v28 = vrot.slane %v3080_v41, %v3451_v12  ;;  %v2526_v29 = vrot.slane %v3082_v43, %v3451_v12  ;;  %v2542_v19 = vrot.slane %v3084_v42, %v3451_v12 }
 0x205   : > { %v2150_v30 = vrot.slane %v2136_v8, %v3451_v12  ;;  %v2558_v31 = vrot.slane %v3086_v46, %v3451_v12  ;;  %v2639_v32 = vrot.slane %v3087_v13, %v3451_v12  ;;  %v2655_v33 = vrot.slane %v3089_v14, %v3451_v12 }
 0x206   : > { %v2183_v34 = vcombine.low %v2127_v22, %v2143_v27  ;;  %v2184_v35 = vcombine.high %v2127_v22, %v2143_v27  ;;  %v2575_v36 = vcombine.low %v2510_v28, %v2526_v29  ;;  %v2576_v37 = vcombine.high %v2510_v28, %v2526_v29 }
 0x207   : > { %2836 = vrot.lane.b32.xlu0 %v2625_v17, %s3328_s24  ;;  %v2199_v38 = vcombine.low %v2134_v24, %v2150_v30  ;;  %v2200_v39 = vcombine.high %v2134_v24, %v2150_v30  ;;  %2840 = vrot.lane.b32.xlu1 %v2626_v25, %s3329_s18  ;;  %v2607_v40 = vcombine.low %v2542_v19, %v2558_v31  ;;  %s3716_s18 = scalar_lea.hbm %s3759_s1, %s3096_s12 }
 0x208   : > { %v2191_v41 = vrot.slane %v2183_v34, %v3457_v26  ;;  %v2198_v43 = vrot.slane %v2184_v35, %v3457_v26  ;;  %v2583_v42 = vrot.slane %v2575_v36, %v3457_v26  ;;  %v2590_v46 = vrot.slane %v2576_v37, %v3457_v26 }
 0x209   : > { %v2207_v47 = vrot.slane %v2199_v38, %v3457_v26  ;;  %v2214_v48 = vrot.slane %v2200_v39, %v3457_v26  ;;  %v2615_v49 = vrot.slane %v2607_v40, %v3457_v26  ;;  %v2608_v50 = vcombine.high %v2542_v19, %v2558_v31 }
 0x20a   : > { %v3088_v51 = vcombine.low %v2191_v41, %v2198_v43  ;;  %v3090_v52 = vcombine.high %v2191_v41, %v2198_v43  ;;  %v2671_v53 = vrot.slane %v3091_v20, %v3451_v12  ;;  %v2687_v54 = vrot.slane %v3093_v21, %v3451_v12 }
 0x20b   : > { %v3092_v55 = vcombine.low %v2207_v47, %v2214_v48  ;;  %v3094_v56 = vcombine.high %v2207_v47, %v2214_v48  ;;  %v2627_v57 = vcombine.low %v2583_v42, %v2615_v49  ;;  %v2628_v58 = vcombine.high %v2583_v42, %v2615_v49 }
 0x20c   : > { %v2622_v59 = vrot.slane %v2608_v50, %v3457_v26  ;;  %v2695_v60 = vcombine.low %v2639_v32, %v2655_v33  ;;  %v2727_v61 = vcombine.low %v2671_v53, %v2687_v54  ;;  %v2646_v62 = vrot.slane %v3088_v51, %v3451_v12 }
 0x20d   : > { %2844 = vrot.lane.b32.xlu0 %v2627_v57, %s3330_s25  ;;  %2848 = vrot.lane.b32.xlu1 %v2628_v58, %s3331_s26  ;;  %v2662_v63 = vrot.slane %v3090_v52, %v3451_v12  ;;  %v2696_v45 = vcombine.high %v2639_v32, %v2655_v33  ;;  %v2728_v2 = vcombine.high %v2671_v53, %v2687_v54  ;;  %s2955_s25 = scalar_lea.sflag [#allocation4], %s3438_s13  ;;  %s3224_s26 = scalar_lea.vmem %s2970_s17, 128 }
 0x20e   : > { %v2703_v0 = vrot.slane %v2695_v60, %v3457_v26  ;;  %v2735_v44 = vrot.slane %v2727_v61, %v3457_v26  ;;  %v2629_v1 = vcombine.low %v2590_v46, %v2622_v59  ;;  %v2630_v3 = vcombine.high %v2590_v46, %v2622_v59  ;;  %p3225_p8 = scmp.ne.s32.totalorder %s2970_s17, %s3224_s26 }
 0x20f   : > { %v2678_v4 = vrot.slane %v3092_v55, %v3451_v12  ;;  %v2694_v7 = vrot.slane %v3094_v56, %v3451_v12  ;;  %v2711_v10 = vcombine.low %v2646_v62, %v2662_v63  ;;  %v2351_v13 = vcombine.low %v3548_v5, %v3551_v6 }
 0x210   : > { %v2759_v9 = vcombine.low %v2703_v0, %v2735_v44  ;;  %v2760_v14 = vcombine.high %v2703_v0, %v2735_v44  ;;  %v2710_v15 = vrot.slane %v2696_v45, %v3457_v26  ;;  %v2742_v16 = vrot.slane %v2728_v2, %v3457_v26  ;;  %p3226_p11 = pnand %p3225_p8, %p3403_p9 }
 0x211   : > { %2852 = vrot.lane.b32.xlu0 %v2629_v1, %s3332_s27  ;;  %2856 = vrot.lane.b32.xlu1 %v2630_v3, %s3333_s28  ;;  %v2743_v11 = vcombine.low %v2678_v4, %v2694_v7  ;;  %v2719_v12 = vrot.slane %v2711_v10, %v3457_v26  ;;  %v2712_v21 = vcombine.high %v2646_v62, %v2662_v63  ;;  %s3230_s27 = scalar_lea.vmem %s3229_s15, 256 }
 0x212   : > { %v2761_v18 = vcombine.low %v2710_v15, %v2742_v16  ;;  %v2762_v20 = vcombine.high %v2710_v15, %v2742_v16  ;;  %v2744_v22 = vcombine.high %v2678_v4, %v2694_v7  ;;  %p3227_p12 = pneg %p3226_p11  ;;  %p3232_p1 = scmp.lt.s32.totalorder %s3230_s27, %s3224_s26 }
 0x213   : > { %v2751_v17 = vrot.slane %v2743_v11, %v3457_v26  ;;  %v2726_v23 = vrot.slane %v2712_v21, %v3457_v26 }
 0x214   : > { %v2758_v24 = vrot.slane %v2744_v22, %v3457_v26  ;;  %p3233_p2 = por %p3232_p1, %p3231_p0 }
 0x215   : > { %2860 = vrot.lane.b32.xlu0 %v2759_v9, %s3308_s23  ;;  %2864 = vrot.lane.b32.xlu1 %v2760_v14, %s3334_s29  ;;  %v2763_v5 = vcombine.low %v2719_v12, %v2751_v17  ;;  %v2764_v6 = vcombine.high %v2719_v12, %v2751_v17  ;;  %s3337_s23 = smov 112  }
 0x216   : > { %v2765_v8 = vcombine.low %v2726_v23, %v2758_v24  ;;  %v2766_v25 = vcombine.high %v2726_v23, %v2758_v24  ;;  %p3234_p3 = pnand %p3233_p2, %p3227_p12 }
 0x219   : > { %2868 = vrot.lane.b32.xlu0 %v2761_v18, %s3335_s30  ;;  %2872 = vrot.lane.b32.xlu1 %v2762_v20, %s3336_s2 }
 0x21d   : > { %2876 = vrot.lane.b32.xlu0 %v2763_v5, %s3337_s23  ;;  %2880 = vrot.lane.b32.xlu1 %v2764_v6, %s3338_s3 }
 0x221   : > { %2884 = vrot.lane.b32.xlu0 %v2765_v8, %s3339_s4  ;;  %2888 = vrot.lane.b32.xlu1 %v2766_v25, %s3340_s5 }
 0x24c   : > { %v2769_v27 = vpop.permute.xlu1 %2768  ;;  %v2773_v19 = vpop.permute.xlu0 %2772 }
 0x24d   : > { %v2892_v30 = vsel %vm2891_vm0, %v2351_v13, %v2769_v27  ;;  %vm2923_vm0 = vcmask 556032  }
 0x24e   : > { %v2894_v32 = vsel %vm2893_vm1, %v2892_v30, %v2773_v19  ;;  %vm2925_vm1 = vcmask 588800  }
 0x250   : > { %v2777_v28 = vpop.permute.xlu1 %2776 }
 0x251   : > { %v2896_v33 = vsel %vm2895_vm2, %v2894_v32, %v2777_v28  ;;  %vm2927_vm2 = vcmask 621568  }
 0x257   : > { %v2789_v26 = vpop.permute.xlu0 %2788 }
 0x258   : > { %v2781_v29 = vpop.permute.xlu1 %2780 }
 0x259   : > { %v2898_v34 = vsel %vm2897_vm3, %v2896_v33, %v2781_v29  ;;  %vm2929_vm3 = vcmask 654336  }
 0x25c   : > { %v2785_v31 = vpop.permute.xlu1 %2784 }
 0x25d   : > { %v2900_v36 = vsel %vm2899_vm4, %v2898_v34, %v2785_v31  ;;  %vm2931_vm4 = vcmask 687104  }
 0x25e   : > { %v2902_v38 = vsel %vm2901_vm5, %v2900_v36, %v2789_v26  ;;  %vm2933_vm5 = vcmask 719872  }
 0x260   : > { %v2793_v35 = vpop.permute.xlu1 %2792 }
 0x261   : > { %v2797_v37 = vpop.permute.xlu0 %2796  ;;  %v2904_v40 = vsel %vm2903_vm6, %v2902_v38, %v2793_v35  ;;  %vm2935_vm6 = vcmask 752640  }
 0x262   : > { %v2906_v43 = vsel %vm2905_vm7, %v2904_v40, %v2797_v37  ;;  %vm2937_vm7 = vcmask 785408  }
 0x264   : > { %v2801_v39 = vpop.permute.xlu1 %2800 }
 0x265   : > { %v2805_v41 = vpop.permute.xlu0 %2804  ;;  %v2908_v46 = vsel %vm2907_vm8, %v2906_v43, %v2801_v39  ;;  %vm2939_vm8 = vcmask 818176  }
 0x266   : > { %v2910_v48 = vsel %vm2909_vm9, %v2908_v46, %v2805_v41  ;;  %vm2941_vm9 = vcmask 850944  }
 0x268   : > { %v2809_v42 = vpop.permute.xlu1 %2808 }
 0x269   : > { %v2912_v50 = vsel %vm2911_vm10, %v2910_v48, %v2809_v42  ;;  %vm2943_vm10 = vcmask 883712  }
 0x26c   : > { %v2813_v47 = vpop.permute.xlu0 %2812  ;;  %v2817_v49 = vpop.permute.xlu1 %2816 }
 0x26d   : > { %v2914_v52 = vsel %vm2913_vm11, %v2912_v50, %v2813_v47  ;;  %vm2945_vm11 = vcmask 916480  }
 0x26e   : > { %v2916_v53 = vsel %vm2915_vm12, %v2914_v52, %v2817_v49  ;;  %vm2947_vm12 = vcmask 949248  }
 0x270   : > { %v2821_v51 = vpop.permute.xlu0 %2820 }
 0x271   : > { %v2825_v54 = vpop.permute.xlu1 %2824  ;;  %v2918_v55 = vsel %vm2917_vm13, %v2916_v53, %v2821_v51  ;;  %vm2949_vm13 = vcmask 982016  }
 0x272   : > { %v2920_v57 = vsel %vm2919_vm14, %v2918_v55, %v2825_v54  ;;  %vm2951_vm14 = vcmask 1014784  }
 0x275   : > { %v2829_v56 = vpop.permute.xlu0 %2828  ;;  %v2833_v58 = vpop.permute.xlu1 %2832 }
 0x276   : > { %v2922_v59 = vsel %vm2921_vm15, %v2920_v57, %v2829_v56 }
 0x277   : > { %v2924_v61 = vsel %vm2923_vm0, %v2922_v59, %v2833_v58 }
 0x279   : > { %v2837_v60 = vpop.permute.xlu0 %2836  ;;  %v2841_v62 = vpop.permute.xlu1 %2840 }
 0x27a   : > { %v2926_v63 = vsel %vm2925_vm1, %v2924_v61, %v2837_v60 }
 0x27b   : > { %v2928_v0 = vsel %vm2927_vm2, %v2926_v63, %v2841_v62 }
 0x27f   : > { %v2845_v44 = vpop.permute.xlu0 %2844  ;;  %v2849_v45 = vpop.permute.xlu1 %2848 }
 0x280   : > { %v2930_v2 = vsel %vm2929_vm3, %v2928_v0, %v2845_v44 }
 0x281   : > { %v2932_v1 = vsel %vm2931_vm4, %v2930_v2, %v2849_v45 }
 0x283   : > { %v2853_v3 = vpop.permute.xlu0 %2852  ;;  %v2857_v4 = vpop.permute.xlu1 %2856 }
 0x284   : > { %v2934_v7 = vsel %vm2933_vm5, %v2932_v1, %v2853_v3 }
 0x285   : > { %v2936_v9 = vsel %vm2935_vm6, %v2934_v7, %v2857_v4 }
 0x287   : > { %v2861_v10 = vpop.permute.xlu0 %2860  ;;  %v2865_v11 = vpop.permute.xlu1 %2864 }
 0x288   : > { %v2938_v13 = vsel %vm2937_vm7, %v2936_v9, %v2861_v10 }
 0x289   : > { %v2940_v14 = vsel %vm2939_vm8, %v2938_v13, %v2865_v11 }
 0x28b   : > { %v2869_v15 = vpop.permute.xlu0 %2868  ;;  %v2873_v16 = vpop.permute.xlu1 %2872 }
 0x28c   : > { %v2942_v12 = vsel %vm2941_vm9, %v2940_v14, %v2869_v15 }
 0x28d   : > { %v2944_v17 = vsel %vm2943_vm10, %v2942_v12, %v2873_v16 }
 0x28f   : > { %v2877_v18 = vpop.permute.xlu0 %2876  ;;  %v2881_v20 = vpop.permute.xlu1 %2880 }
 0x290   : > { %v2946_v21 = vsel %vm2945_vm11, %v2944_v17, %v2877_v18 }
 0x291   : > { %v2948_v22 = vsel %vm2947_vm12, %v2946_v21, %v2881_v20 }
 0x293   : > { %v2885_v5 = vpop.permute.xlu0 %2884  ;;  %v2889_v6 = vpop.permute.xlu1 %2888 }
 0x294   : > { %v2950_v23 = vsel %vm2949_vm13, %v2948_v22, %v2885_v5 }
 0x295   : > { %v2952_v24 = vsel %vm2951_vm14, %v2950_v23, %v2889_v6 }
 0x296   : > { %2953 = vst [vmem:[%s150_s16] sm:$0xff] %v2952_v24 }
 0x297   : > { %3237 = shalt.err (!%p3234_p3)
}
 0x298   : > { %s3238_s28 = scalar_lea.hbm %s3716_s18, 128  ;;  %s3242_s30 = scalar_lea.hbm %s3759_s1, 256 }
 0x299   : > { %p3239_p5 = scmp.ne.s32.totalorder %s3716_s18, %s3238_s28  ;;  %p3243_p10 = scmp.lt.s32.totalorder %s3716_s18, %s3759_s1 }
 0x29a   : > { %p3244_p4 = scmp.lt.s32.totalorder %s3242_s30, %s3238_s28 }
 0x29b   : > { %p3240_p6 = pnand %p3239_p5, %p3403_p9 }
 0x29c   : > { %p3245_p13 = por %p3244_p4, %p3243_p10 }
 0x29d   : > { %p3241_p7 = pneg %p3240_p6 }
 0x29f   : > { %p3246_p8 = pnand %p3245_p13, %p3241_p7 }
 0x2a1   : > { %3249 = shalt.err (!%p3246_p8)
}
 0x2a2   : > { %3102 = dma.vmem_to_hbm [thread:$0]  (%p3403_p9), %s2970_s17, 128, %s3716_s18, %s2955_s25  }
 0x2a3 PF: > { %s2981_s3 = sand.u32 1, %s3284_s6   ;;  %p3765_p11 = scmp.ne.s32.totalorder %s3763_s21, 0 }
 0x2a4   : > { %p3766_p12 = scmp.ge.s32.totalorder %s3304_s11, 2  ;;  %s2982_s4 = scalar_lea.sflag [#allocation4], %s2981_s3 }
 0x2a6   : > { %p3109_p0 = pnand %p3766_p12, %p3765_p11 }
 0x2a8   : > { %p3110_p1 = pneg %p3109_p0 }
 0x2aa   : > { %3279 = dma.done.wait (%p3110_p1), %s2982_s4, 128  }
 0x2ab   : > { %3281 = vsyncadd (%p3110_p1), %s2982_s4, 4294967168  ;;  %s17_s11 = sadd.s32 1, %s3304_s11   ;;  %s3767_s6 = smov %s3288_s7 }
 0x2ac   : > { %p14_p2 = scmp.ge.s32.totalorder %s17_s11, 4   ;;  %s3768_s7 = smov %s3292_s8 }
 0x2ad   : > { %s3769_s8 = smov %s3408_s20  ;;  %s3770_s9 = smov %s3300_s10 }
 0x2ae   : > { %s3771_s10 = smov %s3773_s14  ;;  %16 = sbr.rel (!%p14_p2) target bundleno = 6 (0x6), region = 69 }
 0x2b3   :  { %2987 = vsyncpa [#allocation3], 1 }
 0x2b4   :  { %2989 = vsyncpa [#allocation3 + $0x1], 1 }
 0x2b5   :  { %2990 = vsyncpa [#allocation4], 1 }
 0x2b6   :  { %2992 = vsyncpa [#allocation4 + $0x1], 1 }

</bundles_post_ra>
